<compile_context>
chip_gen: v7x
topology: tpu7x:2x2x1
jax: 0.10.0
libtpu: 0.0.40
codegen_flags: <defaults>
</compile_context>

<pallas_src>
import jax
import jax.numpy as jnp
from jax.experimental import pallas as pl
from jax.experimental.pallas import tpu as pltpu

H3 = 64          # predfc hidden width
IN_PAD = 128     # padded (state_dim + action_dim) lane width
OUT_PAD = 128    # padded output lane width
W_ROWS = 128 + 128 + 128   # 384 rows in the packed weight slab


def _round_up(x, m):
    return ((x + m - 1) // m) * m


def fmodel_old_kernel(x_ref, w_ref, b_ref, out_ref):
    # x tile: (TB, 128) f32, zero-padded past state_dim + action_dim.
    # Cast to bf16 only at the MXU boundary (keeps the f32 (8,128) input tile).
    x = x_ref[...].astype(jnp.bfloat16)

    # Packed bf16 weights, static 128-aligned row slices (all 128 lanes wide).
    w1   = w_ref[0:128, :]     # blkdiag(ws1, wa1), rows past S+A are zero
    w2p1 = w_ref[128:256, :]   # blkdiag(ws2, wa2) @ wp1, cols 64:128 zero
    wp2  = w_ref[256:384, :]   # wp2, rows 64:128 and cols state_dim:128 zero

    # f32 bias rows (bias-add / ReLU stay on the f32 VPU path).
    b1   = b_ref[0]            # (128,)  [bs1 | ba1]
    b2p1 = b_ref[1]            # (128,)  [bs2|ba2]@wp1 + bp1, cols 64:128 zero
    bp2  = b_ref[2]            # (128,)  bp2, cols state_dim:128 zero

    # Stage 1 (fused branches): [relu(state@ws1+bs1) | relu(action@wa1+ba1)]
    h1 = jnp.maximum(
        jnp.dot(x, w1, preferred_element_type=jnp.float32) + b1, 0.0)

    # Stage 2 + predfc[0] fused: relu(h1 @ (blkdiag(ws2,wa2)@wp1) + b2p1)
    #   == relu(concat(state_feature, action_feature) @ wp1 + bp1)
    h2 = jnp.maximum(
        jnp.dot(h1.astype(jnp.bfloat16), w2p1,
                preferred_element_type=jnp.float32) + b2p1, 0.0)

    # predfc[2]: Linear(64, state_dim), lane-dense 128-wide store.
    out = jnp.dot(h2.astype(jnp.bfloat16), wp2,
                  preferred_element_type=jnp.float32) + bp2
    out_ref[...] = out.astype(out_ref.dtype)


def pack_params(params, state_dim, action_dim):
    """Pack all Fmodel_old weights into a (384,128) bf16 slab + (8,128) f32 biases."""
    # Stage-1 block-diagonal fusion of the two first Linears.
    w1 = jnp.zeros((IN_PAD, 128), jnp.float32)
    w1 = w1.at[:state_dim, :64].set(params["ws1"])
    w1 = w1.at[state_dim:state_dim + action_dim, 64:128].set(params["wa1"])

    # Stage-2 block-diagonal (this IS the concat), then fold predfc[0] into it:
    #   feat   = h1 @ blkdiag(ws2, wa2) + [bs2|ba2]
    #   hp_pre = feat @ wp1 + bp1
    #          = h1 @ (blkdiag(ws2,wa2) @ wp1) + ([bs2|ba2] @ wp1 + bp1)
    w2_blk = jnp.zeros((128, 256), jnp.float32)
    w2_blk = w2_blk.at[:64, :128].set(params["ws2"])
    w2_blk = w2_blk.at[64:, 128:].set(params["wa2"])
    b2 = jnp.concatenate([params["bs2"][0], params["ba2"][0]])        # (256,)

    w2p1 = w2_blk @ params["wp1"]                                     # (128,64) f32
    b2p1 = b2 @ params["wp1"] + params["bp1"][0]                      # (64,)

    w2p1_pad = jnp.zeros((128, 128), jnp.float32).at[:, :H3].set(w2p1)
    wp2_pad = jnp.zeros((128, 128), jnp.float32).at[:H3, :state_dim].set(params["wp2"])

    w_packed = jnp.concatenate([w1, w2p1_pad, wp2_pad],
                               axis=0).astype(jnp.bfloat16)           # (384,128)

    b_packed = jnp.zeros((8, 128), jnp.float32)
    b_packed = b_packed.at[0, :64].set(params["bs1"][0])
    b_packed = b_packed.at[0, 64:128].set(params["ba1"][0])
    b_packed = b_packed.at[1, :H3].set(b2p1)
    b_packed = b_packed.at[2, :state_dim].set(params["bp2"][0])
    return w_packed, b_packed


def fmodel_old_forward(state, action, w_packed, b_packed):
    """state: (B, state_dim), action: (B, action_dim). Returns (B, state_dim)."""
    B, state_dim = state.shape
    action_dim = action.shape[1]

    # Batch tile: fill the 256-row MXU when the batch is large; otherwise one
    # f32-tile-aligned block.  Grid is marked "parallel" (v7x 2-TC sharding).
    if B >= 256:
        TB = 256
    else:
        TB = _round_up(max(B, 1), 8)
    B_pad = _round_up(B, TB)

    # x = [state | action | 0...] built into a preallocated zero (B_pad,128).
    x = jnp.zeros((B_pad, IN_PAD), jnp.float32)
    x = x.at[:B, :state_dim].set(state)
    x = x.at[:B, state_dim:state_dim + action_dim].set(action)

    out = pl.pallas_call(
        fmodel_old_kernel,
        out_shape=jax.ShapeDtypeStruct((B_pad, OUT_PAD), jnp.float32),
        grid=(B_pad // TB,),
        in_specs=[
            pl.BlockSpec((TB, IN_PAD), lambda i: (i, 0)),
            pl.BlockSpec((W_ROWS, 128), lambda i: (0, 0)),   # weights resident
            pl.BlockSpec((8, 128), lambda i: (0, 0)),        # biases resident
        ],
        out_specs=pl.BlockSpec((TB, OUT_PAD), lambda i: (i, 0)),
        compiler_params=pltpu.CompilerParams(
            dimension_semantics=("parallel",)),
    )(x, w_packed, b_packed)
    return out[:B, :state_dim]


def init_params(key, state_dim, action_dim):
    """Deterministic synthetic parameters matching Fmodel_old's layer shapes."""
    def linear(key, fan_in, fan_out):
        k_w, k_b = jax.random.split(key)
        scale = 1.0 / jnp.sqrt(jnp.float32(fan_in))
        w = jax.random.uniform(k_w, (fan_in, fan_out), jnp.float32, -scale, scale)
        b = jax.random.uniform(k_b, (1, fan_out), jnp.float32, -scale, scale)
        return w, b

    keys = jax.random.split(key, 6)
    params = {}
    params["ws1"], params["bs1"] = linear(keys[0], state_dim, 64)
    params["ws2"], params["bs2"] = linear(keys[1], 64, 128)
    params["wa1"], params["ba1"] = linear(keys[2], action_dim, 64)
    params["wa2"], params["ba2"] = linear(keys[3], 64, 128)
    params["wp1"], params["bp1"] = linear(keys[4], 256, 64)
    params["wp2"], params["bp2"] = linear(keys[5], 64, state_dim)
    return params


def reference_forward(state, action, p):
    """Pure-JAX f32 reference for correctness checking."""
    h_s = jnp.maximum(state @ p["ws1"] + p["bs1"], 0.0)
    sf = h_s @ p["ws2"] + p["bs2"]
    h_a = jnp.maximum(action @ p["wa1"] + p["ba1"], 0.0)
    af = h_a @ p["wa2"] + p["ba2"]
    feat = jnp.concatenate([sf, af], axis=1)
    h_p = jnp.maximum(feat @ p["wp1"] + p["bp1"], 0.0)
    return h_p @ p["wp2"] + p["bp2"]


if __name__ == "__main__":
    # Small mujoco-like dims: batch=8, state_dim=11, action_dim=3
    B, STATE_DIM, ACTION_DIM = 8, 11, 3

    key = jax.random.PRNGKey(0)
    k_params, k_state, k_action, k_state2, k_action2 = jax.random.split(key, 5)

    params = init_params(k_params, STATE_DIM, ACTION_DIM)
    w_packed, b_packed = pack_params(params, STATE_DIM, ACTION_DIM)

    # --- small batch (single grid step) ---
    state = jax.random.normal(k_state, (B, STATE_DIM), jnp.float32)
    action = jax.random.normal(k_action, (B, ACTION_DIM), jnp.float32)
    out = jax.block_until_ready(fmodel_old_forward(state, action, w_packed, b_packed))
    ref = reference_forward(state, action, params)
    assert out.shape == (B, STATE_DIM)
    # bf16 MXU inputs (f32 accumulation, f32 host-side fusion) vs f32 reference.
    assert jnp.allclose(out, ref, atol=3e-2, rtol=3e-2), "mismatch vs reference (B=8)"

    # --- larger batch: exercises the (parallel) batch grid + padding path ---
    B2 = 300
    state2 = jax.random.normal(k_state2, (B2, STATE_DIM), jnp.float32)
    action2 = jax.random.normal(k_action2, (B2, ACTION_DIM), jnp.float32)
    out2 = jax.block_until_ready(fmodel_old_forward(state2, action2, w_packed, b_packed))
    ref2 = reference_forward(state2, action2, params)
    assert out2.shape == (B2, STATE_DIM)
    assert jnp.allclose(out2, ref2, atol=3e-2, rtol=3e-2), "mismatch vs reference (B=300)"

    print("KERNEL_OK")
</pallas_src>

<mosaic_0001>
module attributes {stable_mosaic.version = 11 : i64} {
  func.func @fmodel_old_kernel(%arg0: i32, %arg1: memref<8x128xf32, #tpu.memory_space<vmem>>, %arg2: memref<384x128xbf16, #tpu.memory_space<vmem>>, %arg3: memref<8x128xf32, #tpu.memory_space<vmem>>, %arg4: memref<8x128xf32, #tpu.memory_space<vmem>>) attributes {dimension_semantics = [#tpu.dimension_semantics<parallel>], iteration_bounds = array<i64: 1>, scalar_prefetch = 0 : i64, scratch_operands = 0 : i64, tpu.core_type = #tpu.core_type<tc>, window_params = [{transform_indices = @transform_0, window_bounds = array<i64: 8, 128>}, {pipeline_mode = #tpu.pipeline_mode<synchronous>, transform_indices = @transform_1, window_bounds = array<i64: 384, 128>}, {pipeline_mode = #tpu.pipeline_mode<synchronous>, transform_indices = @transform_2, window_bounds = array<i64: 8, 128>}, {transform_indices = @transform_3, window_bounds = array<i64: 8, 128>}]} {
    %c0 = arith.constant 0 : index
    %c0_0 = arith.constant 0 : index
    %0 = vector.load %arg1[%c0, %c0_0] : memref<8x128xf32, #tpu.memory_space<vmem>>, vector<8x128xf32>
    %1 = arith.truncf %0 : vector<8x128xf32> to vector<8x128xbf16>
    %c0_1 = arith.constant 0 : index
    %c0_2 = arith.constant 0 : index
    %2 = vector.load %arg2[%c0_1, %c0_2] : memref<384x128xbf16, #tpu.memory_space<vmem>>, vector<128x128xbf16>
    %c128 = arith.constant 128 : index
    %c0_3 = arith.constant 0 : index
    %3 = vector.load %arg2[%c128, %c0_3] : memref<384x128xbf16, #tpu.memory_space<vmem>>, vector<128x128xbf16>
    %c256 = arith.constant 256 : index
    %c0_4 = arith.constant 0 : index
    %4 = vector.load %arg2[%c256, %c0_4] : memref<384x128xbf16, #tpu.memory_space<vmem>>, vector<128x128xbf16>
    %c0_5 = arith.constant 0 : index
    %c0_6 = arith.constant 0 : index
    %5 = vector.load %arg3[%c0_5, %c0_6] : memref<8x128xf32, #tpu.memory_space<vmem>>, vector<1x128xf32>
    %6 = vector.shape_cast %5 : vector<1x128xf32> to vector<128xf32>
    %c1 = arith.constant 1 : index
    %c0_7 = arith.constant 0 : index
    %7 = vector.load %arg3[%c1, %c0_7] : memref<8x128xf32, #tpu.memory_space<vmem>>, vector<1x128xf32>
    %8 = vector.shape_cast %7 : vector<1x128xf32> to vector<128xf32>
    %c2 = arith.constant 2 : index
    %c0_8 = arith.constant 0 : index
    %9 = vector.load %arg3[%c2, %c0_8] : memref<8x128xf32, #tpu.memory_space<vmem>>, vector<1x128xf32>
    %10 = vector.shape_cast %9 : vector<1x128xf32> to vector<128xf32>
    %cst = arith.constant dense<0.000000e+00> : vector<8x128xf32>
    %11 = tpu.matmul %1, %2, %cst {dimension_numbers = #tpu.dot_dimension_numbers<[1], [0], [0], [1], [0, 0, 1, 1], [], []>} : vector<8x128xbf16>, vector<128x128xbf16>, vector<8x128xf32> -> vector<8x128xf32>
    %12 = vector.shape_cast %6 : vector<128xf32> to vector<1x128xf32>
    %13 = vector.broadcast %12 : vector<1x128xf32> to vector<8x128xf32>
    %14 = arith.addf %11, %13 : vector<8x128xf32>
    %cst_9 = arith.constant 0.000000e+00 : f32
    %15 = vector.broadcast %cst_9 : f32 to vector<8x128xf32>
    %16 = arith.maximumf %14, %15 : vector<8x128xf32>
    %17 = arith.truncf %16 : vector<8x128xf32> to vector<8x128xbf16>
    %cst_10 = arith.constant dense<0.000000e+00> : vector<8x128xf32>
    %18 = tpu.matmul %17, %3, %cst_10 {dimension_numbers = #tpu.dot_dimension_numbers<[1], [0], [0], [1], [0, 0, 1, 1], [], []>} : vector<8x128xbf16>, vector<128x128xbf16>, vector<8x128xf32> -> vector<8x128xf32>
    %19 = vector.shape_cast %8 : vector<128xf32> to vector<1x128xf32>
    %20 = vector.broadcast %19 : vector<1x128xf32> to vector<8x128xf32>
    %21 = arith.addf %18, %20 : vector<8x128xf32>
    %cst_11 = arith.constant 0.000000e+00 : f32
    %22 = vector.broadcast %cst_11 : f32 to vector<8x128xf32>
    %23 = arith.maximumf %21, %22 : vector<8x128xf32>
    %24 = arith.truncf %23 : vector<8x128xf32> to vector<8x128xbf16>
    %cst_12 = arith.constant dense<0.000000e+00> : vector<8x128xf32>
    %25 = tpu.matmul %24, %4, %cst_12 {dimension_numbers = #tpu.dot_dimension_numbers<[1], [0], [0], [1], [0, 0, 1, 1], [], []>} : vector<8x128xbf16>, vector<128x128xbf16>, vector<8x128xf32> -> vector<8x128xf32>
    %26 = vector.shape_cast %10 : vector<128xf32> to vector<1x128xf32>
    %27 = vector.broadcast %26 : vector<1x128xf32> to vector<8x128xf32>
    %28 = arith.addf %25, %27 : vector<8x128xf32>
    %c0_13 = arith.constant 0 : index
    %c0_14 = arith.constant 0 : index
    %29 = vector.load %arg4[%c0_13, %c0_14] : memref<8x128xf32, #tpu.memory_space<vmem>>, vector<8x128xf32>
    tpu.vector_store %arg4[%c0_13, %c0_14], %28 {strides = array<i32>} : memref<8x128xf32, #tpu.memory_space<vmem>>, vector<8x128xf32>,
    return
  }
  func.func @transform_0(%arg0: i32) -> (i32, i32) {
    %c0_i32 = arith.constant 0 : i32
    %c0_i32_0 = arith.constant 0 : i32
    return %arg0, %c0_i32 : i32, i32
  }
  func.func @transform_1(%arg0: i32) -> (i32, i32) {
    %c0_i32 = arith.constant 0 : i32
    %c0_i32_0 = arith.constant 0 : i32
    %c0_i32_1 = arith.constant 0 : i32
    return %c0_i32, %c0_i32_0 : i32, i32
  }
  func.func @transform_2(%arg0: i32) -> (i32, i32) {
    %c0_i32 = arith.constant 0 : i32
    %c0_i32_0 = arith.constant 0 : i32
    %c0_i32_1 = arith.constant 0 : i32
    return %c0_i32, %c0_i32_0 : i32, i32
  }
  func.func @transform_3(%arg0: i32) -> (i32, i32) {
    %c0_i32 = arith.constant 0 : i32
    %c0_i32_0 = arith.constant 0 : i32
    return %arg0, %c0_i32 : i32, i32
  }
}

</mosaic_0001>

<bundles_post_ra>
// kernel: tpu_custom_call.1
= control target key start
LH: loop header
LB: loop body
LE: loop exit
PB: predicated region body
PF: predicated region fallthrough
CT: control target
= control target key end

     0   :  { %8 = vsyncpa [#allocation3], 0  ;;  %s749_s0 = inlined_call_operand.hbm [shape: f32[8,128], index: 0, kind: input, shape index: {}]   ;;  %s750_s1 = inlined_call_operand.hbm [shape: bf16[384,128], index: 1, kind: input, shape index: {}]   ;;  %s751_s2 = inlined_call_operand.hbm [shape: f32[8,128], index: 2, kind: input, shape index: {}]   ;;  %s752_s3 = inlined_call_operand.hbm [shape: f32[8,128], index: 3, kind: output, shape index: {}]  }
   0x1   :  { %9 = vsyncpa [#allocation6], 0 }
   0x2   :  { %10 = vsyncpa [#allocation4], 0  ;;  %s643_s12 = smov [#allocation5]   ;;  %s549_s16 = scalar_lea.hbm %s750_s1, 3072 }
   0x3   :  { %s26_s13 = sshll.u32 %s643_s12, 4  ;;  %p550_p0 = scmp.ne.s32.totalorder %s750_s1, %s549_s16  ;;  %s27_s13 = int_to_ptr.vmem [resolvable:$true] %s26_s13 }
   0x4   :  { %p553_p1 = scmp.lt.u32.totalorder %s549_s16, %s750_s1 }
   0x6   :  { %p555_p2 = pnand %p553_p1, %p550_p0 }
   0x8   :  { %558 = shalt.err (!%p555_p2)
}
   0x9   :  { %s559_s21 = scalar_lea.vmem %s27_s13, 3072  ;;  %p564_p4 = scmp.lt.s32.totalorder %s27_s13, %s27_s13 }
   0xa   :  { %p560_p3 = scmp.ne.s32.totalorder %s27_s13, %s559_s21  ;;  %p565_p5 = scmp.lt.s32.totalorder %s559_s21, %s559_s21 }
   0xc   :  { %p566_p6 = por %p565_p5, %p564_p4 }
   0xe   :  { %p567_p7 = pnand %p566_p6, %p560_p3 }
  0x10   :  { %570 = shalt.err (!%p567_p7)
}
  0x11   :  { %s644_s22 = smov 64   ;;  %s645_s23 = smov 4  }
  0x12   :  { %32 = dma.hbm_to_vmem [thread:$0]  %s750_s1, 3072, %s27_s13, [#allocation6], %s644_s22, %s644_s22, %s645_s23  }
  0x13   :  { %s646_s26 = smov [#allocation2]   ;;  %s647_s28 = smov [#allocation7]  }
  0x14   :  { %s17_s27 = sshll.u32 %s646_s26, 4  ;;  %s39_s29 = sshll.u32 %s647_s28, 4  ;;  %s18_s27 = int_to_ptr.vmem [resolvable:$true] %s17_s27  ;;  %s40_s29 = int_to_ptr.vmem [resolvable:$true] %s39_s29 }
  0x15   :  { %s571_s5 = scalar_lea.hbm %s749_s0, 128 }
  0x16   :  { %p572_p8 = scmp.ne.s32.totalorder %s749_s0, %s571_s5  ;;  %p575_p9 = scmp.lt.u32.totalorder %s571_s5, %s749_s0 }
  0x18   :  { %p577_p10 = pnand %p575_p9, %p572_p8 }
  0x1a   :  { %580 = shalt.err (!%p577_p10)
}
  0x1b   :  { %s581_s1 = scalar_lea.vmem %s18_s27, 128  ;;  %p586_p12 = scmp.lt.s32.totalorder %s18_s27, %s18_s27 }
  0x1c   :  { %p582_p11 = scmp.ne.s32.totalorder %s18_s27, %s581_s1  ;;  %p587_p13 = scmp.lt.s32.totalorder %s581_s1, %s581_s1 }
  0x1e   :  { %p588_p0 = por %p587_p13, %p586_p12 }
  0x20   :  { %p589_p1 = pnand %p588_p0, %p582_p11 }
  0x22   :  { %592 = shalt.err (!%p589_p1)
}
  0x23   :  { %20 = dma.hbm_to_vmem [thread:$0]  %s749_s0, 128, %s18_s27, [#allocation3]  }
  0x24   :  { %s593_s14 = scalar_lea.hbm %s751_s2, 128 }
  0x25   :  { %p594_p2 = scmp.ne.s32.totalorder %s751_s2, %s593_s14  ;;  %p597_p3 = scmp.lt.u32.totalorder %s593_s14, %s751_s2 }
  0x27   :  { %p599_p4 = pnand %p597_p3, %p594_p2 }
  0x29   :  { %602 = shalt.err (!%p599_p4)
}
  0x2a   :  { %s603_s19 = scalar_lea.vmem %s40_s29, 128  ;;  %p608_p6 = scmp.lt.s32.totalorder %s40_s29, %s40_s29 }
  0x2b   :  { %p604_p5 = scmp.ne.s32.totalorder %s40_s29, %s603_s19  ;;  %p609_p7 = scmp.lt.s32.totalorder %s603_s19, %s603_s19 }
  0x2d   :  { %p610_p8 = por %p609_p7, %p608_p6 }
  0x2f   :  { %p611_p9 = pnand %p610_p8, %p604_p5 }
  0x31   :  { %614 = shalt.err (!%p611_p9)
}
  0x32   :  { %42 = dma.hbm_to_vmem [thread:$0]  %s751_s2, 128, %s40_s29, [#allocation6]  }
  0x33   :  { %637 = dma.done.wait [#allocation3], 128  }
  0x34   :  { %638 = vsyncadd [#allocation3], 4294967168 }
  0x35   :  { %639 = dma.done.wait [#allocation6], 3200  }
  0x36   :  { %640 = vsyncadd [#allocation6], 4294964096  ;;  %v648_v0 = vmov 0.0   ;;  %vm649_vm0 = vmmov 0   ;;  %v525_v1 = vld [vmem:[#allocation5] sm:$0xff]   ;;  %v526_v2 = vld [vmem:[#allocation5 + $0x8] sm:$0xff]  }
  0x37   :  { %457 = vmatprep.subr.bf16.mxu0 %v648_v0  ;;  %473 = vmatprep.mubr.msk.bf16.mxu0 %vm649_vm0, %v648_v0  ;;  %v527_v3 = vld [vmem:[#allocation5 + $0x10] sm:$0xff]   ;;  %v533_v4 = vld [vmem:[#allocation5 + $0x40] sm:$0xff]   ;;  %v528_v5 = vld [vmem:[#allocation5 + $0x18] sm:$0xff]   ;;  %s650_s2 = smov [#allocation8]  }
  0x38   :  { %477 = vmatprep.subr.bf16.mxu1 %v648_v0  ;;  %493 = vmatprep.mubr.msk.bf16.mxu1 %vm649_vm0, %v648_v0  ;;  %v534_v6 = vld [vmem:[#allocation5 + $0x48] sm:$0xff]   ;;  %v529_v7 = vld [vmem:[#allocation5 + $0x20] sm:$0xff]   ;;  %v535_v8 = vld [vmem:[#allocation5 + $0x50] sm:$0xff]   ;;  %s393_s21 = sshll.u32 %s650_s2, 4  ;;  %s394_s21 = int_to_ptr.vmem [resolvable:$true] %s393_s21 }
  0x39   :  { %458 = vmatpush3.bf16.msra.mxu0 %v525_v1  ;;  %478 = vmatpush3.bf16.msra.mxu1 %v533_v4  ;;  %v530_v9 = vld [vmem:[#allocation5 + $0x28] sm:$0xff]   ;;  %v536_v10 = vld [vmem:[#allocation5 + $0x58] sm:$0xff]   ;;  %v531_v11 = vld [vmem:[#allocation5 + $0x30] sm:$0xff]   ;;  %s615_s22 = scalar_lea.vmem %s394_s21, 128  ;;  %p620_p11 = scmp.lt.s32.totalorder %s394_s21, %s394_s21 }
  0x3a   :  { %459 = vmatprep.subr.bf16.mxu0 %v648_v0  ;;  %479 = vmatprep.subr.bf16.mxu1 %v648_v0  ;;  %v537_v12 = vld [vmem:[#allocation5 + $0x60] sm:$0xff]   ;;  %v532_v13 = vld [vmem:[#allocation5 + $0x38] sm:$0xff]   ;;  %v538_v15 = vld [vmem:[#allocation5 + $0x68] sm:$0xff]   ;;  %p616_p10 = scmp.ne.s32.totalorder %s394_s21, %s615_s22  ;;  %p621_p12 = scmp.lt.s32.totalorder %s615_s22, %s615_s22 }
  0x3b   :  { %v53_v14 = vld [vmem:[#allocation2] sm:$0xff]  ;;  %v539_v17 = vld [vmem:[#allocation5 + $0x70] sm:$0xff]   ;;  %v541_v19 = vld [vmem:[#allocation5 + $0x80] sm:$0xff]  }
  0x3c   :  { %v54_v16 = vpack.c.bf16 %v53_v14, %v53_v14  ;;  %v540_v18 = vld [vmem:[#allocation5 + $0x78] sm:$0xff]   ;;  %v542_v20 = vld [vmem:[#allocation5 + $0x88] sm:$0xff]   ;;  %v543_v21 = vld [vmem:[#allocation5 + $0x90] sm:$0xff]   ;;  %p622_p13 = por %p621_p12, %p620_p11 }
  0x3d   :  { %460 = vmatpush3.bf16.msra.mxu0 %v526_v2  ;;  %480 = vmatpush3.bf16.msra.mxu1 %v534_v6  ;;  %v544_v22 = vld [vmem:[#allocation5 + $0x98] sm:$0xff]   ;;  %v545_v23 = vld [vmem:[#allocation5 + $0xa0] sm:$0xff]   ;;  %v546_v24 = vld [vmem:[#allocation5 + $0xa8] sm:$0xff]  }
  0x3e   :  { %461 = vmatprep.subr.bf16.mxu0 %v648_v0  ;;  %481 = vmatprep.subr.bf16.mxu1 %v648_v0  ;;  %v403_v25 = vld [vmem:[#allocation7] ss:$0 sm:$0xff]  ;;  %v547_v33 = vld [vmem:[#allocation5 + $0xb0] sm:$0xff]   ;;  %v548_v34 = vld [vmem:[#allocation5 + $0xb8] sm:$0xff]   ;;  %p623_p0 = pnand %p622_p13, %p616_p10 }
  0x3f   :  { %v412_v35 = vld [vmem:[#allocation7 + $0x1] ss:$0 sm:$0xff]  ;;  %v421_v43 = vld [vmem:[#allocation7 + $0x2] ss:$0 sm:$0xff] }
  0x41   :  { %462 = vmatpush3.bf16.msra.mxu0 %v527_v3  ;;  %482 = vmatpush3.bf16.msra.mxu1 %v535_v8 }
  0x42   :  { %463 = vmatprep.subr.bf16.mxu0 %v648_v0  ;;  %483 = vmatprep.subr.bf16.mxu1 %v648_v0 }
  0x45   :  { %464 = vmatpush3.bf16.msra.mxu0 %v528_v5  ;;  %484 = vmatpush3.bf16.msra.mxu1 %v536_v10 }
  0x46   :  { %465 = vmatprep.subr.bf16.mxu0 %v648_v0  ;;  %485 = vmatprep.subr.bf16.mxu1 %v648_v0 }
  0x49   :  { %466 = vmatpush3.bf16.msra.mxu0 %v529_v7  ;;  %486 = vmatpush3.bf16.msra.mxu1 %v537_v12 }
  0x4a   :  { %467 = vmatprep.subr.bf16.mxu0 %v648_v0  ;;  %487 = vmatprep.subr.bf16.mxu1 %v648_v0 }
  0x4d   :  { %468 = vmatpush3.bf16.msra.mxu0 %v530_v9  ;;  %488 = vmatpush3.bf16.msra.mxu1 %v538_v15 }
  0x4e   :  { %469 = vmatprep.subr.bf16.mxu0 %v648_v0  ;;  %489 = vmatprep.subr.bf16.mxu1 %v648_v0 }
  0x51   :  { %470 = vmatpush3.bf16.msra.mxu0 %v531_v11  ;;  %490 = vmatpush3.bf16.msra.mxu1 %v539_v17 }
  0x52   :  { %471 = vmatprep.subr.bf16.mxu0 %v648_v0  ;;  %491 = vmatprep.subr.bf16.mxu1 %v648_v0 }
  0x55   :  { %472 = vmatpush3.bf16.msra.mxu0 %v532_v13  ;;  %492 = vmatpush3.bf16.msra.mxu1 %v540_v18 }
  0x56   :  { %497 = vmatprep.subr.bf16.mxu0 %v648_v0 }
  0x58   :  { %474 = vmatmul.mubr.bf16.vlgmr.msra.gmra.mrb[0].mxu0 %v54_v16 }
  0x59   :  { %513 = vmatprep.mubr.msk.bf16.mxu0 %vm649_vm0, %v648_v0  ;;  %498 = vmatpush3.bf16.msra.mxu0 %v541_v19 }
  0x5a   :  { %499 = vmatprep.subr.bf16.mxu0 %v648_v0 }
  0x5d   :  { %500 = vmatpush3.bf16.msra.mxu0 %v542_v20 }
  0x5e   :  { %501 = vmatprep.subr.bf16.mxu0 %v648_v0 }
  0x61   :  { %502 = vmatpush3.bf16.msra.mxu0 %v543_v21 }
  0x62   :  { %503 = vmatprep.subr.bf16.mxu0 %v648_v0 }
  0x65   :  { %504 = vmatpush3.bf16.msra.mxu0 %v544_v22 }
  0x66   :  { %505 = vmatprep.subr.bf16.mxu0 %v648_v0 }
  0x69   :  { %506 = vmatpush3.bf16.msra.mxu0 %v545_v23 }
  0x6a   :  { %507 = vmatprep.subr.bf16.mxu0 %v648_v0 }
  0x6d   :  { %508 = vmatpush3.bf16.msra.mxu0 %v546_v24 }
  0x6e   :  { %509 = vmatprep.subr.bf16.mxu0 %v648_v0 }
  0x71   :  { %510 = vmatpush3.bf16.msra.mxu0 %v547_v33 }
  0x72   :  { %511 = vmatprep.subr.bf16.mxu0 %v648_v0 }
  0x75   :  { %512 = vmatpush3.bf16.msra.mxu0 %v548_v34 }
 0x12b   :  { %v192_v26 = vpop.f32.mrb[0].mxu0 }
 0x12c   :  { %v193_v27 = vadd.f32 %v403_v25, %v192_v26  ;;  %v475_v28 = vpop.f32.mrb[1].mxu0 }
 0x12d   :  { %v195_v29 = vpop.f32.mrb[2].mxu0 }
 0x12e   :  { %v198_v30 = vmax.f32 %v193_v27, 0.0  ;;  %v476_v31 = vpop.f32.mrb[3].mxu0 }
 0x130   :  { %v199_v32 = vpack.c.bf16 %v198_v30, %v198_v30 }
 0x132   :  { %494 = vmatmul.mubr.bf16.vlgmr.msra.gmra.mrb[0].mxu1 %v199_v32 }
 0x205   :  { %v286_v36 = vpop.f32.mrb[0].mxu1 }
 0x206   :  { %v287_v37 = vadd.f32 %v412_v35, %v286_v36  ;;  %v495_v38 = vpop.f32.mrb[1].mxu1 }
 0x207   :  { %v289_v39 = vpop.f32.mrb[2].mxu1 }
 0x208   :  { %v292_v40 = vmax.f32 %v287_v37, 0.0  ;;  %v496_v41 = vpop.f32.mrb[3].mxu1 }
 0x20a   :  { %v293_v42 = vpack.c.bf16 %v292_v40, %v292_v40 }
 0x20c   :  { %514 = vmatmul.mubr.bf16.vlgmr.msra.gmra.mrb[4].mxu0 %v293_v42 }
 0x2df   :  { %v380_v44 = vpop.f32.mrb[4].mxu0 }
 0x2e0   :  { %v381_v45 = vadd.f32 %v421_v43, %v380_v44  ;;  %v515_v46 = vpop.f32.mrb[5].mxu0 }
 0x2e1   :  { %v383_v47 = vpop.f32.mrb[6].mxu0 }
 0x2e2   :  { %386 = vst [vmem:[#allocation8] sm:$0xff] %v381_v45  ;;  %v516_v48 = vpop.f32.mrb[7].mxu0 }
 0x2e3   :  { %626 = shalt.err (!%p623_p0)
}
 0x2e4   :  { %s627_s25 = scalar_lea.hbm %s752_s3, 128 }
 0x2e5   :  { %p628_p1 = scmp.ne.s32.totalorder %s752_s3, %s627_s25  ;;  %p631_p2 = scmp.lt.u32.totalorder %s627_s25, %s752_s3 }
 0x2e7   :  { %p633_p3 = pnand %p631_p2, %p628_p1 }
 0x2e9   :  { %636 = shalt.err (!%p633_p3)
}
 0x2ea   :  { %396 = dma.vmem_to_hbm [thread:$0]  %s394_s21, 128, %s752_s3, [#allocation4]  }
 0x2eb   :  { %641 = dma.done.wait [#allocation4], 128  }
 0x2ec   :  { %642 = vsyncadd [#allocation4], 4294967168 }
 0x2ed   :  { %400 = vsyncpa [#allocation3], 1 }
 0x2ee   :  { %401 = vsyncpa [#allocation6], 1 }
 0x2ef   :  { %402 = vsyncpa [#allocation4], 1 }

</bundles_post_ra>
